<compile_context>
chip_gen: v6e
topology: v6e:2x2x1
jax: 0.10.0
libtpu: 0.0.40
codegen_flags: <defaults>
</compile_context>

<pallas_src>
import functools

import jax
import jax.numpy as jnp
from jax.experimental import pallas as pl
from jax.experimental.pallas import tpu as pltpu

EPS = 1e-10


def _round_up(x, m):
    return ((x + m - 1) // m) * m


def _pick_tile_frames(T, max_tile):
    """Largest frame tile <= max_tile that divides T and is a multiple of 8
    (falls back to the full extent T, which is always a legal block)."""
    if T <= max_tile:
        return T
    for cand in range(min(max_tile, T), 0, -1):
        if T % cand == 0 and cand % 8 == 0:
            return cand
    return T


def _lpaps_kernel(x0_ref, x1_ref, w_ref, sel_ref, out_ref, *, batch,
                  tile_frames, inv_frames):
    """One frame-tile step.

    x0_ref, x1_ref : (B, TILE_T, F)   framed waveforms for this frame tile
    w_ref          : (F, L*C)         all layer projection weights (layer-major lanes)
    sel_ref        : (L*C, LP)        constant block-ones layer selector
    out_ref        : (B, LP)          per-layer temporal sums (resident accumulator)
    """
    t = pl.program_id(0)

    @pl.when(t == 0)
    def _init():
        out_ref[...] = jnp.zeros_like(out_ref)

    B = batch
    TT = tile_frames
    F = x0_ref.shape[-1]
    LP = out_ref.shape[-1]

    # Flatten (B, TILE_T, F) -> (B*TILE_T, F); TILE_T is sublane-aligned.
    x0 = x0_ref[...].reshape(B * TT, F)
    x1 = x1_ref[...].reshape(B * TT, F)
    w = w_ref[...]

    # One lane-dense MXU matmul per input covers every layer.
    f0 = jnp.dot(x0, w, preferred_element_type=jnp.float32)   # (B*TT, L*C)
    f1 = jnp.dot(x1, w, preferred_element_type=jnp.float32)

    # Per-layer channel sums via a constant block-ones selector matmul (MXU),
    # layers already on the lane axis -> no masked 64-lane XLU reduces.
    sel = sel_ref[...]
    saa = jnp.dot(f0 * f0, sel, preferred_element_type=jnp.float32)  # (B*TT, LP)
    sbb = jnp.dot(f1 * f1, sel, preferred_element_type=jnp.float32)
    sab = jnp.dot(f0 * f1, sel, preferred_element_type=jnp.float32)

    # Exact identity for sum_c (f0/(|f0|+eps) - f1/(|f1|+eps))^2.
    na = jnp.sqrt(saa) + EPS
    nb = jnp.sqrt(sbb) + EPS
    inv_na = 1.0 / na          # exact: the identity is cancellation-sensitive
    inv_nb = 1.0 / nb
    d = (saa * inv_na * inv_na + sbb * inv_nb * inv_nb
         - 2.0 * sab * (inv_na * inv_nb))                     # (B*TT, LP)
    # Padded lanes (l >= L) have saa=sbb=sab=0 -> d == 0 exactly.

    # Accumulate this tile's per-batch frame sum into the resident output.
    d3 = d.reshape(B, TT, LP)
    out_ref[...] += jnp.sum(d3, axis=1)                        # (B, LP)

    @pl.when(t == pl.num_programs(0) - 1)
    def _finalize():
        # spatial_average: temporal mean == sum * (1/T), applied once.
        out_ref[...] = out_ref[...] * inv_frames


@functools.partial(jax.jit, static_argnames=("frame_size", "max_tile_frames"))
def lpaps_forward(in0, in1, sample_rates0, sample_rates1, weights,
                  frame_size=32, max_tile_frames=512):
    """LPAPS forward: scalar perceptual distance per batch element, (B, 1, 1)."""
    del sample_rates0, sample_rates1  # unused by the synthetic backbone
    B, N = in0.shape
    F = frame_size
    T = N // F
    L, Fw, C = weights.shape
    assert Fw == F
    LC = L * C
    # Keep feats lane-dense (unmasked vector ops / stores in the kernel).
    assert LC % 128 == 0, "L*C must be a multiple of 128"

    TILE_T = _pick_tile_frames(T, max_tile_frames)
    n_tiles = T // TILE_T

    # All reshapes in glue code so the kernel sees clean tiles.
    x0 = in0[:, : T * F].reshape(B, T, F).astype(jnp.float32)
    x1 = in1[:, : T * F].reshape(B, T, F).astype(jnp.float32)

    # (L, F, C) -> (F, L*C): layer-major blocks of C channels on the lane axis.
    wcat = jnp.transpose(weights, (1, 0, 2)).reshape(F, LC).astype(jnp.float32)

    # Constant block-ones selector: column l sums channels of layer l.
    LP = _round_up(L, 128)
    row_layer = jnp.repeat(jnp.arange(L, dtype=jnp.int32), C)            # (LC,)
    sel = (row_layer[:, None] == jnp.arange(LP, dtype=jnp.int32)[None, :]
           ).astype(jnp.float32)                                          # (LC, LP)

    kernel = functools.partial(_lpaps_kernel, batch=B, tile_frames=TILE_T,
                               inv_frames=1.0 / T)

    per_layer = pl.pallas_call(
        kernel,
        out_shape=jax.ShapeDtypeStruct((B, LP), jnp.float32),
        grid_spec=pltpu.PrefetchScalarGridSpec(
            num_scalar_prefetch=0,
            grid=(n_tiles,),
            in_specs=[
                pl.BlockSpec((B, TILE_T, F), lambda t: (0, t, 0)),  # x0 tile
                pl.BlockSpec((B, TILE_T, F), lambda t: (0, t, 0)),  # x1 tile
                pl.BlockSpec((F, LC), lambda t: (0, 0)),            # weights
                pl.BlockSpec((LC, LP), lambda t: (0, 0)),           # selector
            ],
            out_specs=pl.BlockSpec((B, LP), lambda t: (0, 0)),      # accumulator
        ),
        compiler_params=pltpu.CompilerParams(
            dimension_semantics=("arbitrary",)),
    )(x0, x1, wcat, sel)

    # Sum over layers + reshape to the reference (B, 1, 1) layout (free).
    val = jnp.sum(per_layer[:, :L], axis=1).reshape(B, 1, 1)
    return val


def lpaps_reference(in0, in1, weights, frame_size=32):
    """Pure-JAX reference mirroring the PyTorch module semantics."""
    B, N = in0.shape
    T = N // frame_size
    F = frame_size
    x0 = in0[:, : T * F].reshape(B, T, F).astype(jnp.float32)
    x1 = in1[:, : T * F].reshape(B, T, F).astype(jnp.float32)

    val = jnp.zeros((B, 1, 1), jnp.float32)
    for kk in range(weights.shape[0]):
        # features in NCT layout, exactly like the torch code expects
        f0 = jnp.einsum("btf,fc->bct", x0, weights[kk])  # (B, C, T)
        f1 = jnp.einsum("btf,fc->bct", x1, weights[kk])
        n0 = jnp.sqrt(jnp.sum(f0 ** 2, axis=1, keepdims=True))
        n1 = jnp.sqrt(jnp.sum(f1 ** 2, axis=1, keepdims=True))
        f0n = f0 / (n0 + EPS)
        f1n = f1 / (n1 + EPS)
        diff = (f0n - f1n) ** 2
        s = jnp.sum(diff, axis=1, keepdims=True)          # (B, 1, T)
        res = jnp.mean(s, axis=(1, 2), keepdims=True)     # (B, 1, 1)
        val = val + res
    return val


if __name__ == "__main__":
    key = jax.random.PRNGKey(0)
    k0, k1, kw = jax.random.split(key, 3)

    B = 2           # batch
    FRAME = 32      # frame size F
    T = 16          # number of frames
    N = FRAME * T   # waveform length = 512
    C = 64          # feature channels per layer
    L = 4           # number of backbone layers

    in0 = jax.random.normal(k0, (B, N), jnp.float32)
    in1 = jax.random.normal(k1, (B, N), jnp.float32)
    sample_rates0 = jnp.full((B,), 48000, jnp.int32)
    sample_rates1 = jnp.full((B,), 48000, jnp.int32)
    weights = 0.1 * jax.random.normal(kw, (L, FRAME, C), jnp.float32)

    # max_tile_frames=8 -> 2 grid steps, exercising the accumulator/pipeline path.
    out = lpaps_forward(in0, in1, sample_rates0, sample_rates1, weights,
                        frame_size=FRAME, max_tile_frames=8)
    out = jax.block_until_ready(out)

    ref = lpaps_reference(in0, in1, weights, frame_size=FRAME)
    assert out.shape == (B, 1, 1)
    assert jnp.allclose(out, ref, rtol=1e-4, atol=1e-5), (out, ref)

    print("KERNEL_OK")
</pallas_src>

<mosaic_0001>
module attributes {stable_mosaic.version = 11 : i64} {
  func.func @_lpaps_kernel(%arg0: i32, %arg1: memref<2x8x32xf32, #tpu.memory_space<vmem>>, %arg2: memref<2x8x32xf32, #tpu.memory_space<vmem>>, %arg3: memref<32x256xf32, #tpu.memory_space<vmem>>, %arg4: memref<256x128xf32, #tpu.memory_space<vmem>>, %arg5: memref<2x128xf32, #tpu.memory_space<vmem>>) attributes {dimension_semantics = [#tpu.dimension_semantics<arbitrary>], iteration_bounds = array<i64: 2>, scalar_prefetch = 0 : i64, scratch_operands = 0 : i64, tpu.core_type = #tpu.core_type<tc>, window_params = [{transform_indices = @transform_0, window_bounds = array<i64: 2, 8, 32>}, {transform_indices = @transform_1, window_bounds = array<i64: 2, 8, 32>}, {pipeline_mode = #tpu.pipeline_mode<synchronous>, transform_indices = @transform_2, window_bounds = array<i64: 32, 256>}, {pipeline_mode = #tpu.pipeline_mode<synchronous>, transform_indices = @transform_3, window_bounds = array<i64: 256, 128>}, {pipeline_mode = #tpu.pipeline_mode<synchronous>, transform_indices = @transform_4, window_bounds = array<i64: 2, 128>}]} {
    %c0_i32 = arith.constant 0 : i32
    %0 = arith.cmpi eq, %arg0, %c0_i32 : i32
    %1 = arith.extui %0 : i1 to i32
    %c0_i32_0 = arith.constant 0 : i32
    %2 = arith.cmpi ne, %1, %c0_i32_0 : i32
    scf.if %2 {
      %cst_25 = arith.constant 0.000000e+00 : f32
      %45 = vector.broadcast %cst_25 : f32 to vector<2x128xf32>
      %c0_26 = arith.constant 0 : index
      %c0_27 = arith.constant 0 : index
      %46 = vector.load %arg5[%c0_26, %c0_27] : memref<2x128xf32, #tpu.memory_space<vmem>>, vector<2x128xf32>
      tpu.vector_store %arg5[%c0_26, %c0_27], %45 {strides = array<i32>} : memref<2x128xf32, #tpu.memory_space<vmem>>, vector<2x128xf32>,
    } else {
    }
    %c0 = arith.constant 0 : index
    %c0_1 = arith.constant 0 : index
    %c0_2 = arith.constant 0 : index
    %3 = vector.load %arg1[%c0, %c0_1, %c0_2] : memref<2x8x32xf32, #tpu.memory_space<vmem>>, vector<2x8x32xf32>
    %4 = vector.shape_cast %3 : vector<2x8x32xf32> to vector<16x32xf32>
    %c0_3 = arith.constant 0 : index
    %c0_4 = arith.constant 0 : index
    %c0_5 = arith.constant 0 : index
    %5 = vector.load %arg2[%c0_3, %c0_4, %c0_5] : memref<2x8x32xf32, #tpu.memory_space<vmem>>, vector<2x8x32xf32>
    %6 = vector.shape_cast %5 : vector<2x8x32xf32> to vector<16x32xf32>
    %c0_6 = arith.constant 0 : index
    %c0_7 = arith.constant 0 : index
    %7 = vector.load %arg3[%c0_6, %c0_7] : memref<32x256xf32, #tpu.memory_space<vmem>>, vector<32x256xf32>
    %cst = arith.constant dense<0.000000e+00> : vector<16x256xf32>
    %8 = tpu.matmul %4, %7, %cst {dimension_numbers = #tpu.dot_dimension_numbers<[1], [0], [0], [1], [0, 0, 1, 1], [], []>} : vector<16x32xf32>, vector<32x256xf32>, vector<16x256xf32> -> vector<16x256xf32>
    %cst_8 = arith.constant dense<0.000000e+00> : vector<16x256xf32>
    %9 = tpu.matmul %6, %7, %cst_8 {dimension_numbers = #tpu.dot_dimension_numbers<[1], [0], [0], [1], [0, 0, 1, 1], [], []>} : vector<16x32xf32>, vector<32x256xf32>, vector<16x256xf32> -> vector<16x256xf32>
    %c0_9 = arith.constant 0 : index
    %c0_10 = arith.constant 0 : index
    %10 = vector.load %arg4[%c0_9, %c0_10] : memref<256x128xf32, #tpu.memory_space<vmem>>, vector<256x128xf32>
    %11 = arith.mulf %8, %8 : vector<16x256xf32>
    %cst_11 = arith.constant dense<0.000000e+00> : vector<16x128xf32>
    %12 = tpu.matmul %11, %10, %cst_11 {dimension_numbers = #tpu.dot_dimension_numbers<[1], [0], [0], [1], [0, 0, 1, 1], [], []>} : vector<16x256xf32>, vector<256x128xf32>, vector<16x128xf32> -> vector<16x128xf32>
    %13 = arith.mulf %9, %9 : vector<16x256xf32>
    %cst_12 = arith.constant dense<0.000000e+00> : vector<16x128xf32>
    %14 = tpu.matmul %13, %10, %cst_12 {dimension_numbers = #tpu.dot_dimension_numbers<[1], [0], [0], [1], [0, 0, 1, 1], [], []>} : vector<16x256xf32>, vector<256x128xf32>, vector<16x128xf32> -> vector<16x128xf32>
    %15 = arith.mulf %8, %9 : vector<16x256xf32>
    %cst_13 = arith.constant dense<0.000000e+00> : vector<16x128xf32>
    %16 = tpu.matmul %15, %10, %cst_13 {dimension_numbers = #tpu.dot_dimension_numbers<[1], [0], [0], [1], [0, 0, 1, 1], [], []>} : vector<16x256xf32>, vector<256x128xf32>, vector<16x128xf32> -> vector<16x128xf32>
    %17 = math.sqrt %12 : vector<16x128xf32>
    %cst_14 = arith.constant 1.000000e-10 : f32
    %18 = vector.broadcast %cst_14 : f32 to vector<16x128xf32>
    %19 = arith.addf %17, %18 : vector<16x128xf32>
    %20 = math.sqrt %14 : vector<16x128xf32>
    %cst_15 = arith.constant 1.000000e-10 : f32
    %21 = vector.broadcast %cst_15 : f32 to vector<16x128xf32>
    %22 = arith.addf %20, %21 : vector<16x128xf32>
    %cst_16 = arith.constant 1.000000e+00 : f32
    %23 = vector.broadcast %cst_16 : f32 to vector<16x128xf32>
    %24 = arith.divf %23, %19 : vector<16x128xf32>
    %cst_17 = arith.constant 1.000000e+00 : f32
    %25 = vector.broadcast %cst_17 : f32 to vector<16x128xf32>
    %26 = arith.divf %25, %22 : vector<16x128xf32>
    %27 = arith.mulf %12, %24 : vector<16x128xf32>
    %28 = arith.mulf %27, %24 : vector<16x128xf32>
    %29 = arith.mulf %14, %26 : vector<16x128xf32>
    %30 = arith.mulf %29, %26 : vector<16x128xf32>
    %31 = arith.addf %28, %30 : vector<16x128xf32>
    %cst_18 = arith.constant 2.000000e+00 : f32
    %32 = vector.broadcast %cst_18 : f32 to vector<16x128xf32>
    %33 = arith.mulf %32, %16 : vector<16x128xf32>
    %34 = arith.mulf %24, %26 : vector<16x128xf32>
    %35 = arith.mulf %33, %34 : vector<16x128xf32>
    %36 = arith.subf %31, %35 : vector<16x128xf32>
    %37 = vector.shape_cast %36 : vector<16x128xf32> to vector<2x8x128xf32>
    %c0_19 = arith.constant 0 : index
    %c0_20 = arith.constant 0 : index
    %38 = vector.load %arg5[%c0_19, %c0_20] : memref<2x128xf32, #tpu.memory_space<vmem>>, vector<2x128xf32>
    %cst_21 = arith.constant dense<0.000000e+00> : vector<2x128xf32>
    %39 = vector.multi_reduction <add>, %37, %cst_21 [1] : vector<2x8x128xf32> to vector<2x128xf32>
    %40 = arith.addf %38, %39 : vector<2x128xf32>
    %c0_22 = arith.constant 0 : index
    %c0_23 = arith.constant 0 : index
    %41 = vector.load %arg5[%c0_22, %c0_23] : memref<2x128xf32, #tpu.memory_space<vmem>>, vector<2x128xf32>
    tpu.vector_store %arg5[%c0_22, %c0_23], %40 {strides = array<i32>} : memref<2x128xf32, #tpu.memory_space<vmem>>, vector<2x128xf32>,
    %c1_i32 = arith.constant 1 : i32
    %42 = arith.cmpi eq, %arg0, %c1_i32 : i32
    %43 = arith.extui %42 : i1 to i32
    %c0_i32_24 = arith.constant 0 : i32
    %44 = arith.cmpi ne, %43, %c0_i32_24 : i32
    scf.if %44 {
      %c0_25 = arith.constant 0 : index
      %c0_26 = arith.constant 0 : index
      %45 = vector.load %arg5[%c0_25, %c0_26] : memref<2x128xf32, #tpu.memory_space<vmem>>, vector<2x128xf32>
      %cst_27 = arith.constant 6.250000e-02 : f32
      %46 = vector.broadcast %cst_27 : f32 to vector<2x128xf32>
      %47 = arith.mulf %45, %46 : vector<2x128xf32>
      %c0_28 = arith.constant 0 : index
      %c0_29 = arith.constant 0 : index
      %48 = vector.load %arg5[%c0_28, %c0_29] : memref<2x128xf32, #tpu.memory_space<vmem>>, vector<2x128xf32>
      tpu.vector_store %arg5[%c0_28, %c0_29], %47 {strides = array<i32>} : memref<2x128xf32, #tpu.memory_space<vmem>>, vector<2x128xf32>,
    } else {
    }
    return
  }
  func.func @transform_0(%arg0: i32) -> (i32, i32, i32) {
    %c0_i32 = arith.constant 0 : i32
    %c0_i32_0 = arith.constant 0 : i32
    %c0_i32_1 = arith.constant 0 : i32
    return %c0_i32, %arg0, %c0_i32_0 : i32, i32, i32
  }
  func.func @transform_1(%arg0: i32) -> (i32, i32, i32) {
    %c0_i32 = arith.constant 0 : i32
    %c0_i32_0 = arith.constant 0 : i32
    %c0_i32_1 = arith.constant 0 : i32
    return %c0_i32, %arg0, %c0_i32_0 : i32, i32, i32
  }
  func.func @transform_2(%arg0: i32) -> (i32, i32) {
    %c0_i32 = arith.constant 0 : i32
    %c0_i32_0 = arith.constant 0 : i32
    %c0_i32_1 = arith.constant 0 : i32
    return %c0_i32, %c0_i32_0 : i32, i32
  }
  func.func @transform_3(%arg0: i32) -> (i32, i32) {
    %c0_i32 = arith.constant 0 : i32
    %c0_i32_0 = arith.constant 0 : i32
    %c0_i32_1 = arith.constant 0 : i32
    return %c0_i32, %c0_i32_0 : i32, i32
  }
  func.func @transform_4(%arg0: i32) -> (i32, i32) {
    %c0_i32 = arith.constant 0 : i32
    %c0_i32_0 = arith.constant 0 : i32
    %c0_i32_1 = arith.constant 0 : i32
    return %c0_i32, %c0_i32_0 : i32, i32
  }
}

</mosaic_0001>

<bundles_post_ra>
// kernel: eq.8
= control target key start
LH: loop header
LB: loop body
LE: loop exit
PB: predicated region body
PF: predicated region fallthrough
CT: control target
= control target key end

     0   :  { %s7_s8 = smov 3  ;;  %vm9_vm0 = vcmask 523264   ;;  %s27_s9 = smov 64   ;;  %vm16_vm1 = vcmask 1048064   ;;  %s44_s0 = inlined_call_operand.vmem [shape: s32[4,64], index: 0, kind: input, shape index: {}]   ;;  %s45_s1 = inlined_call_operand.vmem [shape: s32[256], index: 1, kind: output, shape index: {}]  }
   0x1   :  { %v5_v0 = vld [vmem:[%s44_s0] sm:$0xf]  ;;  %s12_s0 = smov 3 }
   0x2   :  { %6 = vst [vmem:[#allocation1] sm:$0xf] %v5_v0 }
   0x9   :  { %v13_v1 = vld [vmem:[#allocation1 + $0x1] ss:$2 sm:%s12_s0]   ;;  %v8_v2 = vld [vmem:[#allocation1] ss:$2 sm:%s7_s8]  }
   0xa   :  { %14 = vrot.lane.b32.xlu0 %v13_v1, %s27_s9  ;;  %10 = vst.msk [vmem:[#allocation0] sm:$0x3] %vm9_vm0, %v8_v2  }
  0x7c   :  { %v15_v3 = vpop.permute.xlu0 %14  }
  0x7d   :  { %17 = vst.msk [vmem:[#allocation0] sm:$0x3] %vm16_vm1, %v15_v3  }
  0x84   :  { %v22_v4 = vld [vmem:[#allocation0] sm:$0x3] }
  0x85   :  { %25 = vst [vmem:[%s45_s1] sm:$0x3] %v22_v4 }

// kernel: lpaps_forward.1
= control target key start
LH: loop header
LB: loop body
LE: loop exit
PB: predicated region body
PF: predicated region fallthrough
CT: control target
= control target key end

     0   :  { %s1096_s15 = smov 0   ;;  %s1098_s16 = smov 0   ;;  %s1471_s0 = inlined_call_operand.vmem [shape: f32[2,16,32], index: 0, kind: input, shape index: {}]   ;;  %s1472_s1 = inlined_call_operand.vmem [shape: f32[2,16,32], index: 1, kind: input, shape index: {}]   ;;  %s1473_s2 = inlined_call_operand.vmem [shape: f32[32,256], index: 2, kind: input, shape index: {}]   ;;  %s1474_s3 = inlined_call_operand.vmem [shape: f32[256,128], index: 3, kind: input, shape index: {}]   ;;  %s1475_s4 = inlined_call_operand.vmem [shape: f32[2,128], index: 4, kind: output, shape index: {}]  }
   0x1   :  { %s1100_s17 = smov 0  }
   0x2 LB: > { %s871_s18 = sadd.s32 4294967295, %s1067_s17   ;;  %s1113_s19 = sadd.s32 1, %s1067_s17   ;;  %s1067_s17 = sphi %s1100_s17, %s1479_s17   ;;  %s1063_s16 = sphi %s1098_s16, %s1478_s16   ;;  %s1059_s15 = sphi %s1096_s15, %s1477_s15  }
   0x3   : > { %s18_s20 = ssub.s32 %s1067_s17, %s1113_s19  ;;  %s21_s21 = sadd.s32 1, %s1063_s16 }
   0x4   : > { %p19_p0 = scmp.eq.s32.totalorder %s18_s20, 0  ;;  %p28_p1 = scmp.ne.s32.totalorder %s1063_s16, %s1059_s15 }
   0x5   : > { %p29_p2 = scmp.eq.s32.totalorder %s1067_s17, 0  ;;  %p873_p4 = scmp.ge.s32.totalorder %s1067_s17, 2 }
   0x6   : > { %s1122_s22 = scalar_select %p19_p0, %s1063_s16, %s21_s21  }
   0x7   : > { %p1124_p3 = por %p29_p2, %p28_p1  ;;  %149 = sbr.rel (%p873_p4) target bundleno = 22 (0x16), region = 24 }
   0xc   : > { %152 = sbr.rel (!%p1124_p3) target bundleno = 17 (0x11), region = 28  ;;  %s154_s24 = sand.u32 (%p1124_p3), 1, %s1063_s16  }
   0xd   : > { %s875_s25 = sshll.u32 (%p1124_p3), %s1067_s17, 3  ;;  %s874_s26 = sshll.u32 (%p1124_p3), %s154_s24, 4 }
   0xe   : > { %s158_s29 = scalar_lea.vmem (%p1124_p3), %s1471_s0, %s875_s25  ;;  %s156_s30 = scalar_lea.vmem (%p1124_p3), [#allocation2], %s874_s26 }
   0xf   : > { %v189_v0 = vld [vmem:[%s158_s29] sm:$0xff] (%p1124_p3)  ;;  %v191_v1 = vld [vmem:[%s158_s29 + $0x10] sm:$0xff] (%p1124_p3) }
  0x10   : > { %190 = vst [vmem:[%s156_s30] sm:$0xff] (%p1124_p3), %v189_v0  ;;  %192 = vst [vmem:[%s156_s30 + $0x8] sm:$0xff] (%p1124_p3), %v191_v1 }
  0x11 PF: > { %198 = sbr.rel (!%p1124_p3) target bundleno = 22 (0x16), region = 66  ;;  %s200_s5 = sand.u32 (%p1124_p3), 1, %s1063_s16  }
  0x12   : > { %s877_s6 = sshll.u32 (%p1124_p3), %s1067_s17, 3  ;;  %s876_s7 = sshll.u32 (%p1124_p3), %s200_s5, 4 }
  0x13   : > { %s204_s10 = scalar_lea.vmem (%p1124_p3), %s1472_s1, %s877_s6  ;;  %s202_s11 = scalar_lea.vmem (%p1124_p3), [#allocation3], %s876_s7 }
  0x14   : > { %v235_v2 = vld [vmem:[%s204_s10] sm:$0xff] (%p1124_p3)  ;;  %v237_v3 = vld [vmem:[%s204_s10 + $0x10] sm:$0xff] (%p1124_p3) }
  0x15   : > { %236 = vst [vmem:[%s202_s11] sm:$0xff] (%p1124_p3), %v235_v2  ;;  %238 = vst [vmem:[%s202_s11 + $0x8] sm:$0xff] (%p1124_p3), %v237_v3 }
  0x16 PF: > { %p878_p5 = scmp.ge.s32.totalorder %s1067_s17, 1  ;;  %p243_p6 = scmp.lt.s32.totalorder %s1067_s17, 3 }
  0x18   : > { %p244_p7 = pnand %p878_p5, %p243_p6 }
  0x19   : > { %s250_s12 = sand.u32 (!%p244_p7), 1, %s1059_s15   ;;  %p881_p8 = scmp.ne.s32.totalorder (!%p244_p7), %s871_s18, 0 }
  0x1a   : > { %247 = sbr.rel (%p244_p7) target bundleno = 523 (0x20b), region = 104  ;;  %s1146_s13 = sshll.u32 (!%p244_p7), %s250_s12, 4 }
  0x1b   : > { %s252_s14 = scalar_lea.vmem (!%p244_p7), [#allocation2], %s1146_s13  ;;  %s259_s20 = scalar_lea.vmem (!%p244_p7), [#allocation3], %s1146_s13 }
  0x1f   : > { %284 = sbr.rel (%p881_p8) target bundleno = 38 (0x26), region = 116 }
  0x24   : > { %v1069_v4 = vmov 0.0  }
  0x25   : > { %285 = vst [vmem:[%s1475_s4] sm:$0x3] %v1069_v4 }
  0x26 PF: > { %v297_v5 = vld [vmem:[%s1473_s2 + $0x38] sm:$0xff]  ;;  %v296_v6 = vld [vmem:[%s1473_s2 + $0x30] sm:$0xff]  ;;  %v295_v7 = vld [vmem:[%s1473_s2 + $0x28] sm:$0xff]  ;;  %v1070_v9 = vmov 0.0   ;;  %vm298_vm0 = vcmask 261120   ;;  %vm807_vm9 = vcmask 1041409  }
  0x27   : > { %329 = vmatprep.subr.mxu1 %v297_v5  ;;  %v294_v8 = vld [vmem:[%s1473_s2 + $0x20] sm:$0xff]  ;;  %369 = vmatprep.mubr.f32.mxu1 %v1070_v9  ;;  %v293_v10 = vld [vmem:[%s1473_s2 + $0x18] sm:$0xff]  ;;  %v292_v11 = vld [vmem:[%s1473_s2 + $0x10] sm:$0xff]  ;;  %p886_p9 = scmp.ne.s32.totalorder %s871_s18, 1 }
  0x28   : > { %330 = vmatpush1.msra.mxu1 %v296_v6  ;;  %v291_v12 = vld [vmem:[%s1473_s2 + $0x8] sm:$0xff]  ;;  %v1179_v13 = vld [vmem:[%s1474_s3 + $0xf8] sm:$0xff]  ;;  %v1189_v15 = vld [vmem:[%s1474_s3 + $0xf0] sm:$0xff] }
  0x29   : > { %331 = vmatprep.subr.mxu1 %v295_v7  ;;  %v1184_v14 = vld [vmem:[%s1474_s3 + $0x78] sm:$0xff]  ;;  %v290_v16 = vld [vmem:[%s1473_s2] sm:$0xff]  ;;  %889 = vmatprep.subr.mxu0 %v1179_v13  ;;  %v1198_v17 = vld [vmem:[%s1474_s3 + $0x70] sm:$0xff] }
  0x2a   : > { %332 = vmatpush1.msra.mxu1 %v294_v8  ;;  %v286_v18 = vld [vmem:[%s252_s14] sm:$0xff]  ;;  %890 = vmatpush3.msra.mxu0 %v1184_v14  ;;  %v1208_v19 = vld [vmem:[%s1474_s3 + $0xe8] sm:$0xff]  ;;  %v1236_v25 = vld [vmem:[%s1474_s3 + $0xd8] sm:$0xff] }
  0x2b   : > { %333 = vmatprep.subr.mxu1 %v293_v10  ;;  %891 = vmatprep.subr.mxu0 %v1189_v15  ;;  %v1214_v20 = vld [vmem:[%s1474_s3 + $0x68] sm:$0xff]  ;;  %v1223_v22 = vld [vmem:[%s1474_s3 + $0xe0] sm:$0xff]  ;;  %v1242_v26 = vld [vmem:[%s1474_s3 + $0x58] sm:$0xff] }
  0x2c   : > { %334 = vmatpush1.msra.mxu1 %v292_v11  ;;  %892 = vmatpush3.msra.mxu0 %v1198_v17  ;;  %v287_v21 = vld [vmem:[%s252_s14 + $0x8] sm:$0xff]  ;;  %v1229_v23 = vld [vmem:[%s1474_s3 + $0x60] sm:$0xff]  ;;  %v1248_v27 = vld [vmem:[%s1474_s3 + $0xd0] sm:$0xff] }
  0x2d   : > { %335 = vmatprep.subr.mxu1 %v291_v12  ;;  %893 = vmatprep.subr.mxu0 %v1208_v19  ;;  %v288_v24 = vld [vmem:[%s259_s20] sm:$0xff]  ;;  %v289_v29 = vld [vmem:[%s259_s20 + $0x8] sm:$0xff] }
  0x2e   : > { %336 = vmatpush1.msra.mxu1 %v290_v16  ;;  %894 = vmatpush3.msra.mxu0 %v1214_v20  ;;  %v1255_v28 = vld [vmem:[%s1474_s3 + $0x50] sm:$0xff]  ;;  %v1265_v30 = vld [vmem:[%s1474_s3 + $0xc8] sm:$0xff]  ;;  %v1279_v32 = vld [vmem:[%s1474_s3 + $0xc0] sm:$0xff] }
  0x2f   : > { %882 = vmatmul.mubr.msk.f32.vlgmr.msra.gmra.mxu1 %vm298_vm0, %v286_v18  ;;  %412 = vmatprep.subr.mxu1 %v297_v5  ;;  %v1272_v31 = vld [vmem:[%s1474_s3 + $0x48] sm:$0xff]  ;;  %v1286_v33 = vld [vmem:[%s1474_s3 + $0x40] sm:$0xff]  ;;  %v1293_v34 = vld [vmem:[%s1474_s3 + $0xb8] sm:$0xff] }
  0x30   : > { %413 = vmatpush1.msra.mxu1 %v296_v6  ;;  %375 = vmatprep.mubr.f32.mxu1 %v1070_v9  ;;  %v1300_v35 = vld [vmem:[%s1474_s3 + $0x38] sm:$0xff]  ;;  %v1307_v36 = vld [vmem:[%s1474_s3 + $0xb0] sm:$0xff]  ;;  %v1321_v38 = vld [vmem:[%s1474_s3 + $0xa8] sm:$0xff] }
  0x31   : > { %414 = vmatprep.subr.mxu1 %v295_v7  ;;  %895 = vmatprep.subr.mxu0 %v1223_v22  ;;  %v1314_v37 = vld [vmem:[%s1474_s3 + $0x30] sm:$0xff]  ;;  %v1328_v39 = vld [vmem:[%s1474_s3 + $0x28] sm:$0xff]  ;;  %v1335_v40 = vld [vmem:[%s1474_s3 + $0xa0] sm:$0xff] }
  0x32   : > { %415 = vmatpush1.msra.mxu1 %v294_v8  ;;  %896 = vmatpush3.msra.mxu0 %v1229_v23  ;;  %v1342_v41 = vld [vmem:[%s1474_s3 + $0x20] sm:$0xff]  ;;  %v1349_v42 = vld [vmem:[%s1474_s3 + $0x98] sm:$0xff]  ;;  %v1363_v44 = vld [vmem:[%s1474_s3 + $0x90] sm:$0xff] }
  0x33   : > { %883 = vmatmul.mubr.msk.f32.gmra.mxu1 %vm298_vm0, %v287_v21  ;;  %416 = vmatprep.subr.mxu1 %v293_v10  ;;  %v1356_v43 = vld [vmem:[%s1474_s3 + $0x18] sm:$0xff]  ;;  %v1383_v45 = vld [vmem:[%s1474_s3 + $0x10] sm:$0xff]  ;;  %v1389_v46 = vld [vmem:[%s1474_s3 + $0x88] sm:$0xff] }
  0x34   : > { %417 = vmatpush1.msra.mxu1 %v292_v11  ;;  %452 = vmatprep.mubr.f32.mxu1 %v1070_v9  ;;  %v1396_v47 = vld [vmem:[%s1474_s3 + $0x8] sm:$0xff]  ;;  %v1403_v48 = vld [vmem:[%s1474_s3 + $0x80] sm:$0xff] }
  0x35   : > { %418 = vmatprep.subr.mxu1 %v291_v12  ;;  %897 = vmatprep.subr.mxu0 %v1236_v25  ;;  %v1410_v49 = vld [vmem:[%s1474_s3] sm:$0xff] }
  0x36   : > { %419 = vmatpush1.msra.mxu1 %v290_v16  ;;  %898 = vmatpush3.msra.mxu0 %v1242_v26 }
  0x37   : > { %884 = vmatmul.mubr.msk.f32.vlgmr.msra.gmra.mxu1 %vm298_vm0, %v288_v24  ;;  %927 = vmatprep.subr.mxu1 %v1179_v13 }
  0x38   : > { %458 = vmatprep.mubr.f32.mxu1 %v1070_v9  ;;  %899 = vmatprep.subr.mxu0 %v1248_v27 }
  0x39   : > { %928 = vmatpush3.msra.mxu1 %v1184_v14  ;;  %900 = vmatpush3.msra.mxu0 %v1255_v28 }
  0x3a   : > { %929 = vmatprep.subr.mxu1 %v1189_v15  ;;  %901 = vmatprep.subr.mxu0 %v1265_v30 }
  0x3b   : > { %885 = vmatmul.mubr.msk.f32.gmra.mxu1 %vm298_vm0, %v289_v29  ;;  %902 = vmatpush3.msra.mxu0 %v1272_v31 }
  0x3c   : > { %930 = vmatpush3.msra.mxu1 %v1198_v17  ;;  %903 = vmatprep.subr.mxu0 %v1279_v32 }
  0x3d   : > { %931 = vmatprep.subr.mxu1 %v1208_v19  ;;  %904 = vmatpush3.msra.mxu0 %v1286_v33 }
  0x3e   : > { %932 = vmatpush3.msra.mxu1 %v1214_v20  ;;  %905 = vmatprep.subr.mxu0 %v1293_v34 }
  0x3f   : > { %933 = vmatprep.subr.mxu1 %v1223_v22  ;;  %906 = vmatpush3.msra.mxu0 %v1300_v35 }
  0x40   : > { %934 = vmatpush3.msra.mxu1 %v1229_v23  ;;  %907 = vmatprep.subr.mxu0 %v1307_v36 }
  0x41   : > { %935 = vmatprep.subr.mxu1 %v1236_v25  ;;  %908 = vmatpush3.msra.mxu0 %v1314_v37 }
  0x42   : > { %936 = vmatpush3.msra.mxu1 %v1242_v26  ;;  %909 = vmatprep.subr.mxu0 %v1321_v38 }
  0x43   : > { %937 = vmatprep.subr.mxu1 %v1248_v27  ;;  %910 = vmatpush3.msra.mxu0 %v1328_v39 }
  0x44   : > { %938 = vmatpush3.msra.mxu1 %v1255_v28  ;;  %911 = vmatprep.subr.mxu0 %v1335_v40 }
  0x45   : > { %939 = vmatprep.subr.mxu1 %v1265_v30  ;;  %912 = vmatpush3.msra.mxu0 %v1342_v41 }
  0x46   : > { %940 = vmatpush3.msra.mxu1 %v1272_v31  ;;  %913 = vmatprep.subr.mxu0 %v1349_v42 }
  0x47   : > { %941 = vmatprep.subr.mxu1 %v1279_v32  ;;  %914 = vmatpush3.msra.mxu0 %v1356_v43 }
  0x48   : > { %942 = vmatpush3.msra.mxu1 %v1286_v33  ;;  %915 = vmatprep.subr.mxu0 %v1363_v44 }
  0x49   : > { %943 = vmatprep.subr.mxu1 %v1293_v34  ;;  %916 = vmatpush3.msra.mxu0 %v1383_v45 }
  0x4a   : > { %944 = vmatpush3.msra.mxu1 %v1300_v35  ;;  %917 = vmatprep.subr.mxu0 %v1389_v46 }
  0x4b   : > { %945 = vmatprep.subr.mxu1 %v1307_v36  ;;  %918 = vmatpush3.msra.mxu0 %v1396_v47 }
  0x4c   : > { %946 = vmatpush3.msra.mxu1 %v1314_v37  ;;  %919 = vmatprep.subr.mxu0 %v1403_v48 }
  0x4d   : > { %947 = vmatprep.subr.mxu1 %v1321_v38  ;;  %920 = vmatpush3.msra.mxu0 %v1410_v49 }
  0x4e   : > { %948 = vmatpush3.msra.mxu1 %v1328_v39  ;;  %965 = vmatprep.subr.mxu0 %v1179_v13 }
  0x4f   : > { %949 = vmatprep.subr.mxu1 %v1335_v40 }
  0x50   : > { %950 = vmatpush3.msra.mxu1 %v1342_v41 }
  0x51   : > { %951 = vmatprep.subr.mxu1 %v1349_v42 }
  0x52   : > { %952 = vmatpush3.msra.mxu1 %v1356_v43 }
  0x53   : > { %953 = vmatprep.subr.mxu1 %v1363_v44 }
  0x54   : > { %954 = vmatpush3.msra.mxu1 %v1383_v45 }
  0x55   : > { %955 = vmatprep.subr.mxu1 %v1389_v46 }
  0x56   : > { %956 = vmatpush3.msra.mxu1 %v1396_v47 }
  0x57   : > { %957 = vmatprep.subr.mxu1 %v1403_v48 }
  0x58   : > { %958 = vmatpush3.msra.mxu1 %v1410_v49 }
  0xef   : > { %v371_v50 = vpop.f32.mrf.mxu1 }
  0xf0   : > { %v497_v53 = vmul.f32 %v371_v50, %v371_v50 }
  0xf1   : > { %v373_v51 = vpop.f32.mrf.mxu1 }
  0xf2   : > { %v498_v52 = vmul.f32 %v373_v51, %v373_v51 }
  0xf3   : > { %v377_v54 = vpop.f32.mrf.mxu1 }
  0xf4   : > { %565 = vmatprep.mubr.f32.mxu0 %v498_v52  ;;  %v499_v57 = vmul.f32 %v377_v54, %v377_v54 }
  0xf5   : > { %v379_v55 = vpop.f32.mrf.mxu1  ;;  %566 = vmatmul.mubr.f32.vlgmr.msra.gmra.mxu0 %v497_v53 }
  0xf6   : > { %v500_v56 = vmul.f32 %v379_v55, %v379_v55  ;;  %966 = vmatpush3.msra.mxu0 %v1184_v14 }
  0xf7   : > { %967 = vmatprep.subr.mxu0 %v1189_v15  ;;  %v454_v58 = vpop.f32.mrf.mxu1 }
  0xf8   : > { %968 = vmatpush3.msra.mxu0 %v1198_v17  ;;  %570 = vmatprep.mubr.f32.mxu0 %v500_v56  ;;  %v576_v63 = vmul.f32 %v454_v58, %v454_v58  ;;  %v655_v3 = vmul.f32 %v454_v58, %v371_v50 }
  0xf9   : > { %969 = vmatprep.subr.mxu0 %v1208_v19  ;;  %v456_v59 = vpop.f32.mrf.mxu1  ;;  %571 = vmatmul.mubr.f32.gmra.mxu0 %v499_v57 }
  0xfa   : > { %v577_v60 = vmul.f32 %v456_v59, %v456_v59  ;;  %v656_v61 = vmul.f32 %v456_v59, %v373_v51  ;;  %970 = vmatpush3.msra.mxu0 %v1214_v20 }
  0xfb   : > { %971 = vmatprep.subr.mxu0 %v1223_v22  ;;  %v460_v62 = vpop.f32.mrf.mxu1 }
  0xfc   : > { %972 = vmatpush3.msra.mxu0 %v1229_v23  ;;  %644 = vmatprep.mubr.f32.mxu1 %v577_v60  ;;  %v578_v2 = vmul.f32 %v460_v62, %v460_v62  ;;  %v657_v5 = vmul.f32 %v460_v62, %v377_v54 }
  0xfd   : > { %973 = vmatprep.subr.mxu0 %v1236_v25  ;;  %723 = vmatprep.mubr.f32.mxu0 %v656_v61  ;;  %v462_v0 = vpop.f32.mrf.mxu1 }
  0xfe   : > { %v579_v1 = vmul.f32 %v462_v0, %v462_v0  ;;  %645 = vmatmul.mubr.f32.vlgmr.msra.gmra.mxu1 %v576_v63  ;;  %974 = vmatpush3.msra.mxu0 %v1242_v26  ;;  %v658_v4 = vmul.f32 %v462_v0, %v379_v55 }
  0xff   : > { %975 = vmatprep.subr.mxu0 %v1248_v27 }
 0x100   : > { %976 = vmatpush3.msra.mxu0 %v1255_v28  ;;  %649 = vmatprep.mubr.f32.mxu1 %v579_v1 }
 0x101   : > { %977 = vmatprep.subr.mxu0 %v1265_v30 }
 0x102   : > { %650 = vmatmul.mubr.f32.gmra.mxu1 %v578_v2  ;;  %978 = vmatpush3.msra.mxu0 %v1272_v31 }
 0x103   : > { %979 = vmatprep.subr.mxu0 %v1279_v32 }
 0x104   : > { %980 = vmatpush3.msra.mxu0 %v1286_v33 }
 0x105   : > { %981 = vmatprep.subr.mxu0 %v1293_v34 }
 0x106   : > { %982 = vmatpush3.msra.mxu0 %v1300_v35 }
 0x107   : > { %983 = vmatprep.subr.mxu0 %v1307_v36 }
 0x108   : > { %984 = vmatpush3.msra.mxu0 %v1314_v37 }
 0x109   : > { %985 = vmatprep.subr.mxu0 %v1321_v38 }
 0x10a   : > { %986 = vmatpush3.msra.mxu0 %v1328_v39 }
 0x10b   : > { %987 = vmatprep.subr.mxu0 %v1335_v40 }
 0x10c   : > { %988 = vmatpush3.msra.mxu0 %v1342_v41 }
 0x10d   : > { %989 = vmatprep.subr.mxu0 %v1349_v42 }
 0x10e   : > { %990 = vmatpush3.msra.mxu0 %v1356_v43 }
 0x10f   : > { %991 = vmatprep.subr.mxu0 %v1363_v44 }
 0x110   : > { %992 = vmatpush3.msra.mxu0 %v1383_v45 }
 0x111   : > { %993 = vmatprep.subr.mxu0 %v1389_v46 }
 0x112   : > { %994 = vmatpush3.msra.mxu0 %v1396_v47 }
 0x113   : > { %995 = vmatprep.subr.mxu0 %v1403_v48 }
 0x114   : > { %996 = vmatpush3.msra.mxu0 %v1410_v49 }
 0x115   : > { %724 = vmatmul.mubr.f32.vlgmr.msra.gmra.mxu0 %v655_v3 }
 0x116   : > { %728 = vmatprep.mubr.f32.mxu0 %v658_v4 }
 0x119   : > { %729 = vmatmul.mubr.f32.gmra.mxu0 %v657_v5 }
 0x1b5   : > { %v921_v6 = vpop.f32.mrf.mxu0 }
 0x1b7   : > { %v922_v7 = vpop.f32.mrf.mxu0 }
 0x1b8   : > { %v923_v8 = vadd.f32 %v922_v7, %v921_v6 }
 0x1b9   : > { %v924_v9 = vpop.f32.mrf.mxu0 }
 0x1ba   : > { %1029 = vrsqrt.f32 %v923_v8  ;;  %vm736_vm1 = vcmp.eq.f32.partialorder %v923_v8, inf  ;;  %v739_v21 = vand.u32 2147483648, %v923_v8  ;;  %vm738_vm2 = vcmp.eq.f32.partialorder %v923_v8, 0.0 }
 0x1bb   : > { %v925_v10 = vpop.f32.mrf.mxu0 }
 0x1bc   : > { %v926_v11 = vadd.f32 %v925_v10, %v924_v9 }
 0x1be   : > { %1031 = vrsqrt.f32 %v926_v11  ;;  %v959_v12 = vpop.f32.mrf.mxu1  ;;  %vm743_vm3 = vcmp.eq.f32.partialorder %v926_v11, inf  ;;  %v746_v25 = vand.u32 2147483648, %v926_v11  ;;  %vm745_vm4 = vcmp.eq.f32.partialorder %v926_v11, 0.0 }
 0x1c0   : > { %v960_v13 = vpop.f32.mrf.mxu1 }
 0x1c1   : > { %v961_v14 = vadd.f32 %v960_v13, %v959_v12 }
 0x1c2   : > { %v962_v15 = vpop.f32.mrf.mxu1 }
 0x1c3   : > { %1033 = vrsqrt.f32 %v961_v14  ;;  %vm752_vm5 = vcmp.eq.f32.partialorder %v961_v14, inf  ;;  %v755_v32 = vand.u32 2147483648, %v961_v14  ;;  %vm754_vm6 = vcmp.eq.f32.partialorder %v961_v14, 0.0 }
 0x1c4   : > { %v963_v16 = vpop.f32.mrf.mxu1 }
 0x1c5   : > { %v964_v17 = vadd.f32 %v963_v16, %v962_v15 }
 0x1c7   : > { %v1030_v18 = vpop.eup %1029  ;;  %1035 = vrsqrt.f32 %v964_v17  ;;  %vm759_vm7 = vcmp.eq.f32.partialorder %v964_v17, inf  ;;  %v762_v38 = vand.u32 2147483648, %v964_v17  ;;  %vm761_vm8 = vcmp.eq.f32.partialorder %v964_v17, 0.0 }
 0x1c8   : > { %v735_v19 = vmul.f32 %v1030_v18, %v923_v8 }
 0x1ca   : > { %v737_v20 = vsel %vm736_vm1, %v923_v8, %v735_v19 }
 0x1cb   : > { %v1032_v22 = vpop.eup %1031  ;;  %v740_v23 = vsel %vm738_vm2, %v739_v21, %v737_v20 }
 0x1cc   : > { %v742_v24 = vmul.f32 %v1032_v22, %v926_v11  ;;  %v748_v27 = vadd.f32 1e-10, %v740_v23 }
 0x1ce   : > { %v744_v26 = vsel %vm743_vm3, %v926_v11, %v742_v24  ;;  %1037 = vrcp.f32 %v748_v27 }
 0x1cf   : > { %v747_v28 = vsel %vm745_vm4, %v746_v25, %v744_v26 }
 0x1d0   : > { %v1034_v29 = vpop.eup %1033  ;;  %v749_v31 = vadd.f32 1e-10, %v747_v28 }
 0x1d1   : > { %v751_v30 = vmul.f32 %v1034_v29, %v961_v14 }
 0x1d2   : > { %1039 = vrcp.f32 %v749_v31 }
 0x1d3   : > { %v753_v33 = vsel %vm752_vm5, %v961_v14, %v751_v30 }
 0x1d4   : > { %v1036_v34 = vpop.eup %1035  ;;  %v756_v35 = vsel %vm754_vm6, %v755_v32, %v753_v33 }
 0x1d5   : > { %v764_v36 = vadd.f32 1e-10, %v756_v35  ;;  %v758_v37 = vmul.f32 %v1036_v34, %v964_v17  ;;  %v997_v41 = vpop.f32.mrf.mxu0 }
 0x1d7   : > { %1041 = vrcp.f32 %v764_v36  ;;  %v760_v39 = vsel %vm759_vm7, %v964_v17, %v758_v37  ;;  %v998_v43 = vpop.f32.mrf.mxu0 }
 0x1d8   : > { %v763_v40 = vsel %vm761_vm8, %v762_v38, %v760_v39  ;;  %v999_v46 = vadd.f32 %v998_v43, %v997_v41 }
 0x1d9   : > { %v765_v42 = vadd.f32 1e-10, %v763_v40  ;;  %v1000_v45 = vpop.f32.mrf.mxu0 }
 0x1da   : > { %v784_v53 = vmul.f32 2.0, %v999_v46 }
 0x1db   : > { %1043 = vrcp.f32 %v765_v42  ;;  %v1038_v44 = vpop.eup %1037  ;;  %v1001_v50 = vpop.f32.mrf.mxu0 }
 0x1dc   : > { %v774_v48 = vmul.f32 %v1038_v44, %v923_v8  ;;  %v1002_v56 = vadd.f32 %v1001_v50, %v1000_v45 }
 0x1de   : > { %v776_v54 = vmul.f32 %v1038_v44, %v774_v48  ;;  %v785_v2 = vmul.f32 2.0, %v1002_v56 }
 0x1df   : > { %v1040_v47 = vpop.eup %1039 }
 0x1e0   : > { %v775_v57 = vmul.f32 %v1040_v47, %v926_v11 }
 0x1e2   : > { %v777_v0 = vmul.f32 %v1040_v47, %v775_v57 }
 0x1e4   : > { %v1042_v49 = vpop.eup %1041 }
 0x1e5   : > { %v778_v51 = vmul.f32 %v1042_v49, %v961_v14  ;;  %v786_v52 = vmul.f32 %v1042_v49, %v1038_v44 }
 0x1e7   : > { %v780_v55 = vmul.f32 %v1042_v49, %v778_v51  ;;  %v788_v60 = vmul.f32 %v786_v52, %v784_v53 }
 0x1e8   : > { %v1044_v58 = vpop.eup %1043 }
 0x1e9   : > { %v782_v59 = vadd.f32 %v780_v55, %v776_v54  ;;  %v779_v61 = vmul.f32 %v1044_v58, %v964_v17  ;;  %v787_v62 = vmul.f32 %v1044_v58, %v1040_v47  ;;  %v792_v17 = vld [vmem:[%s1475_s4] sm:$0x3] }
 0x1eb   : > { %v790_v63 = vsub.f32 %v782_v59, %v788_v60  ;;  %v781_v1 = vmul.f32 %v1044_v58, %v779_v61  ;;  %v789_v5 = vmul.f32 %v787_v62, %v785_v2 }
 0x1ed   : > { %v793_v3 = vrot.slane %v790_v63, 4  ;;  %v783_v4 = vadd.f32 %v781_v1, %v777_v0 }
 0x1ef   : > { %v794_v6 = vadd.f32 %v793_v3, %v790_v63  ;;  %v791_v7 = vsub.f32 %v783_v4, %v789_v5 }
 0x1f1   : > { %v795_v8 = vrot.slane %v794_v6, 2  ;;  %v799_v9 = vrot.slane %v791_v7, 4 }
 0x1f3   : > { %v796_v10 = vadd.f32 %v795_v8, %v794_v6  ;;  %v800_v12 = vadd.f32 %v799_v9, %v791_v7 }
 0x1f5   : > { %v801_v13 = vrot.slane %v800_v12, 2  ;;  %v797_v11 = vrot.slane %v796_v10, 1 }
 0x1f7   : > { %v802_v14 = vadd.f32 %v801_v13, %v800_v12  ;;  %v798_v16 = vadd.f32 %v797_v11, %v796_v10 }
 0x1f9   : > { %v803_v15 = vrot.slane %v802_v14, 1 }
 0x1fb   : > { %v804_v18 = vadd.f32 %v803_v15, %v802_v14 }
 0x1fc   : > { %815 = sbr.rel (%p886_p9) target bundleno = 523 (0x20b), region = 120 }
 0x1fd   : > { %v808_v19 = vsel %vm807_vm9, %v804_v18, %v798_v16 }
 0x1fe   : > { %v810_v20 = vadd.f32 %v808_v19, %v792_v17 }
 0x200   : > { %811 = vst [vmem:[%s1475_s4] sm:$0x3] %v810_v20 }
 0x207   : > { %v816_v21 = vld [vmem:[%s1475_s4] sm:$0x3] }
 0x208   : > { %v817_v22 = vmul.f32 0.0625, %v816_v21 }
 0x20a   : > { %818 = vst [vmem:[%s1475_s4] sm:$0x3] %v817_v22 }
 0x20b PF: > { %p11_p10 = scmp.ge.s32.totalorder %s1113_s19, 4   ;;  %s1477_s15 = smov %s1063_s16 }
 0x20c   : > { %s1478_s16 = smov %s1122_s22  ;;  %s1479_s17 = smov %s1113_s19 }
 0x20d   :  { %13 = sbr.rel (!%p11_p10) target bundleno = 2 (0x2), region = 159 }

</bundles_post_ra>
